<compile_context>
chip_gen: v7x
topology: tpu7x:2x2x1
jax: 0.10.0
libtpu: 0.0.40
codegen_flags: <defaults>
</compile_context>

<pallas_src>
from functools import partial

import jax
import jax.numpy as jnp
from jax.experimental import pallas as pl
from jax.experimental.pallas import tpu as pltpu


# ---------------------------------------------------------------------------
# helpers
# ---------------------------------------------------------------------------
def _round_up(x, m):
    return ((x + m - 1) // m) * m


def _select_m_tile(M, K_pad, D_pad, max_tm=512, vmem_budget=24 * 1024 * 1024):
    """Largest M tile (multiple of 16) <= max_tm whose working set fits VMEM."""
    tm = min(max_tm, _round_up(max(M, 16), 16))
    tm -= tm % 16

    def working_set(t):
        x_bytes = 2 * t * K_pad * 2          # double-buffered bf16 X tile
        o_bytes = 2 * t * D_pad * 2          # double-buffered bf16 output tile
        w_bytes = K_pad * D_pad * 2          # resident bf16 weight
        b_bytes = D_pad * 4                  # resident f32 bias
        tmp = t * D_pad * 4                  # f32 matmul result before cast
        return x_bytes + o_bytes + w_bytes + b_bytes + tmp

    while tm > 16 and working_set(tm) > vmem_budget:
        tm -= 16
    return max(tm, 16)


# ---------------------------------------------------------------------------
# Pallas kernel: single-shot-K patch-embedding matmul + bias
# ---------------------------------------------------------------------------
def _patch_embed_kernel(x_ref, w_ref, b_ref, o_ref):
    # x_ref: [tm, K_pad] bf16   w_ref: [K_pad, D_pad] bf16 (VMEM-resident)
    # b_ref: [1, D_pad]  f32    o_ref: [tm, D_pad]   bf16
    acc = jnp.dot(x_ref[...], w_ref[...], preferred_element_type=jnp.float32)
    o_ref[...] = (acc + b_ref[...]).astype(o_ref.dtype)


def _patch_embed_matmul(x_p, w, b, tm):
    """x_p: [M_pad, K_pad] bf16, w: [K_pad, D_pad] bf16, b: [1, D_pad] f32
    -> [M_pad, D_pad] bf16.  Grid only over M; W and bias resident in VMEM."""
    M_pad, K_pad = x_p.shape
    _, D_pad = w.shape
    grid = (M_pad // tm,)

    cost = pl.CostEstimate(
        flops=2 * M_pad * K_pad * D_pad,
        transcendentals=0,
        bytes_accessed=(M_pad * K_pad + K_pad * D_pad + M_pad * D_pad) * 2
        + D_pad * 4,
    )

    return pl.pallas_call(
        _patch_embed_kernel,
        out_shape=jax.ShapeDtypeStruct((M_pad, D_pad), jnp.bfloat16),
        grid_spec=pltpu.PrefetchScalarGridSpec(
            num_scalar_prefetch=0,
            grid=grid,
            in_specs=[
                pl.BlockSpec((tm, K_pad), lambda i: (i, 0)),
                pl.BlockSpec((K_pad, D_pad), lambda i: (0, 0)),  # resident weight
                pl.BlockSpec((1, D_pad), lambda i: (0, 0)),      # resident bias
            ],
            out_specs=pl.BlockSpec((tm, D_pad), lambda i: (i, 0)),
        ),
        compiler_params=pltpu.CompilerParams(
            dimension_semantics=("parallel",),   # v7x: M tiles split across TCs
        ),
        cost_estimate=cost,
    )(x_p, w, b)


# ---------------------------------------------------------------------------
# Jitted vision-tower forward (fused im2col/cast/pad + matmul + one slice)
# ---------------------------------------------------------------------------
@partial(jax.jit, static_argnames=("patch", "hidden"))
def _vision_tower_forward(images, w_flat_pad, bias_pad, patch, hidden):
    # images: [B, C, H, W] (NCHW, matching PyTorch)
    B, C, H, W = images.shape
    P = patch
    gh, gw = H // P, W // P
    M = B * gh * gw
    K = C * P * P
    K_pad, D_pad = w_flat_pad.shape

    tm = _select_m_tile(M, K_pad, D_pad)
    M_pad = _round_up(max(M, tm), tm)

    # im2col + bf16 cast + zero-pad fused into a single prologue materialization
    # of the [M_pad, K_pad] kernel input.
    x = images.reshape(B, C, gh, P, gw, P)
    x = jnp.transpose(x, (0, 2, 4, 1, 3, 5)).reshape(M, K).astype(jnp.bfloat16)
    x = jnp.pad(x, ((0, M_pad - M), (0, K_pad - K)))

    out = _patch_embed_matmul(x, w_flat_pad, bias_pad, tm)   # [M_pad, D_pad] bf16
    # single combined slice over padded M rows and padded hidden lanes
    return out[:M, :hidden].reshape(B, gh * gw, hidden)


# ---------------------------------------------------------------------------
# BaseVisionTower equivalent
# ---------------------------------------------------------------------------
class BaseVisionTowerPallas:
    """JAX/Pallas port of BaseVisionTower.

    forward(images):
      - list input  -> [_forward(image[None, ...]) for image in images]
                       (same-shape lists batched into one kernel launch)
      - array input -> _forward(images)
    _forward is the (synthetic) vision tower: patch embedding.
    """

    def __init__(self, vision_tower_name, vision_tower_cfg, delay_load=False,
                 *, in_channels=4, patch_size=8, hidden_size=32, seed=0):
        self.is_loaded = False
        self.vision_tower_name = vision_tower_name
        self.delay_load = delay_load
        self._hidden_size = hidden_size
        self._patch = patch_size
        self._in_ch = in_channels

        # Deterministic synthetic parameters (Conv2d(C, D, P, stride=P) shapes).
        # TODO(synk): load_model / real pretrained vision-tower weights have no
        # Pallas equivalent here; parameters are synthetic and deterministic.
        key = jax.random.PRNGKey(seed)
        kw, kb = jax.random.split(key)
        # PyTorch conv weight layout: [D, C, P, P]
        self.conv_w = jax.random.normal(
            kw, (hidden_size, in_channels, patch_size, patch_size),
            dtype=jnp.float32) * 0.02
        self.conv_b = jax.random.normal(kb, (hidden_size,), dtype=jnp.float32) * 0.02

        # Flatten & pad once at init: [K_pad, D_pad] bf16 weight, [1, D_pad] f32 bias.
        K = in_channels * patch_size * patch_size
        self._K = K
        self._K_pad = _round_up(K, 128)
        self._D_pad = _round_up(hidden_size, 128)   # lane-dense, full-width output
        w_flat = self.conv_w.reshape(hidden_size, K).T        # [K, D] (c, ph, pw)
        self._w_flat_pad = jnp.pad(
            w_flat, ((0, self._K_pad - K), (0, self._D_pad - hidden_size))
        ).astype(jnp.bfloat16)
        self._b_pad = jnp.pad(
            self.conv_b.reshape(1, hidden_size),
            ((0, 0), (0, self._D_pad - hidden_size)),
        ).astype(jnp.float32)
        self.is_loaded = True

    # ----- properties mirroring the torch module -----
    @property
    def hidden_size(self):
        return self._hidden_size

    @property
    def dtype(self):
        return self.conv_w.dtype

    @property
    def dummy_feature(self):
        return jnp.zeros((1, self.hidden_size), dtype=self.dtype)

    # ----- vision tower forward -----
    def _forward(self, images):
        B, C, H, W = images.shape
        P = self._patch
        assert C == self._in_ch and H % P == 0 and W % P == 0
        return _vision_tower_forward(images, self._w_flat_pad, self._b_pad,
                                     patch=P, hidden=self._hidden_size)

    # ----- BaseVisionTower.forward semantics -----
    def forward(self, images):
        if isinstance(images, list):
            shapes = {tuple(im.shape) for im in images}
            if len(shapes) == 1 and len(images) > 0:
                # Batch same-shaped images into a single kernel launch, then
                # split back into per-image [1, N, D] features.
                batched = jnp.stack(images, axis=0)
                feats = self._forward(batched)
                return [feats[i:i + 1] for i in range(len(images))]
            return [self._forward(image[None, ...]) for image in images]
        return self._forward(images)

    __call__ = forward


# ---------------------------------------------------------------------------
# Reference (pure JAX, same bf16 input rounding) for sanity checking
# ---------------------------------------------------------------------------
def _reference_forward(tower, images):
    B, C, H, W = images.shape
    P = tower._patch
    gh, gw = H // P, W // P
    x = images.reshape(B, C, gh, P, gw, P)
    x = jnp.transpose(x, (0, 2, 4, 1, 3, 5)).reshape(B, gh * gw, C * P * P)
    xb = x.astype(jnp.bfloat16).astype(jnp.float32)
    wb = tower.conv_w.reshape(tower.hidden_size, -1).T
    wb = wb.astype(jnp.bfloat16).astype(jnp.float32)
    return jnp.einsum("bnk,kd->bnd", xb, wb) + tower.conv_b[None, None, :]


if __name__ == "__main__":
    key = jax.random.PRNGKey(0)
    tower = BaseVisionTowerPallas("synthetic-vit", vision_tower_cfg=None,
                                  in_channels=4, patch_size=8, hidden_size=32)

    # Tensor-input path: images [B=2, C=4, H=16, W=16]  (NCHW)
    k1, k2, k3 = jax.random.split(key, 3)
    images = jax.random.normal(k1, (2, 4, 16, 16), dtype=jnp.float32)
    feats = tower(images)
    feats = jax.block_until_ready(feats)
    ref = _reference_forward(tower, images)
    assert feats.shape == (2, 4, 32), feats.shape
    assert jnp.allclose(feats.astype(jnp.float32), ref, atol=2e-2, rtol=2e-2)

    # List-input path: list of [C, H, W] images -> list of [1, N, D] features
    img_list = [jax.random.normal(k2, (4, 16, 16), dtype=jnp.float32),
                jax.random.normal(k3, (4, 16, 16), dtype=jnp.float32)]
    feats_list = tower(img_list)
    feats_list = [jax.block_until_ready(f) for f in feats_list]
    for f, img in zip(feats_list, img_list):
        assert f.shape == (1, 4, 32), f.shape
        ref_i = _reference_forward(tower, img[None, ...])
        assert jnp.allclose(f.astype(jnp.float32), ref_i, atol=2e-2, rtol=2e-2)

    print("KERNEL_OK")
</pallas_src>

<mosaic_0001>
module attributes {stable_mosaic.version = 11 : i64} {
  func.func @_patch_embed_kernel(%arg0: i32, %arg1: memref<16x256xbf16, #tpu.memory_space<vmem>>, %arg2: memref<256x128xbf16, #tpu.memory_space<vmem>>, %arg3: memref<1x128xf32, #tpu.memory_space<vmem>>, %arg4: memref<16x128xbf16, #tpu.memory_space<vmem>>) attributes {dimension_semantics = [#tpu.dimension_semantics<parallel>], iteration_bounds = array<i64: 1>, scalar_prefetch = 0 : i64, scratch_operands = 0 : i64, tpu.core_type = #tpu.core_type<tc>, window_params = [{transform_indices = @transform_0, window_bounds = array<i64: 16, 256>}, {pipeline_mode = #tpu.pipeline_mode<synchronous>, transform_indices = @transform_1, window_bounds = array<i64: 256, 128>}, {pipeline_mode = #tpu.pipeline_mode<synchronous>, transform_indices = @transform_2, window_bounds = array<i64: 1, 128>}, {transform_indices = @transform_3, window_bounds = array<i64: 16, 128>}]} {
    %c0 = arith.constant 0 : index
    %c0_0 = arith.constant 0 : index
    %0 = vector.load %arg1[%c0, %c0_0] : memref<16x256xbf16, #tpu.memory_space<vmem>>, vector<16x256xbf16>
    %c0_1 = arith.constant 0 : index
    %c0_2 = arith.constant 0 : index
    %1 = vector.load %arg2[%c0_1, %c0_2] : memref<256x128xbf16, #tpu.memory_space<vmem>>, vector<256x128xbf16>
    %cst = arith.constant dense<0.000000e+00> : vector<16x128xf32>
    %2 = tpu.matmul %0, %1, %cst {dimension_numbers = #tpu.dot_dimension_numbers<[1], [0], [0], [1], [0, 0, 1, 1], [], []>} : vector<16x256xbf16>, vector<256x128xbf16>, vector<16x128xf32> -> vector<16x128xf32>
    %c0_3 = arith.constant 0 : index
    %c0_4 = arith.constant 0 : index
    %3 = vector.load %arg3[%c0_3, %c0_4] : memref<1x128xf32, #tpu.memory_space<vmem>>, vector<1x128xf32>
    %4 = vector.broadcast %3 : vector<1x128xf32> to vector<16x128xf32>
    %5 = arith.addf %2, %4 : vector<16x128xf32>
    %6 = arith.truncf %5 : vector<16x128xf32> to vector<16x128xbf16>
    %c0_5 = arith.constant 0 : index
    %c0_6 = arith.constant 0 : index
    %7 = vector.load %arg4[%c0_5, %c0_6] : memref<16x128xbf16, #tpu.memory_space<vmem>>, vector<16x128xbf16>
    tpu.vector_store %arg4[%c0_5, %c0_6], %6 {strides = array<i32>} : memref<16x128xbf16, #tpu.memory_space<vmem>>, vector<16x128xbf16>,
    return
  }
  func.func @transform_0(%arg0: i32) -> (i32, i32) {
    %c0_i32 = arith.constant 0 : i32
    %c0_i32_0 = arith.constant 0 : i32
    return %arg0, %c0_i32 : i32, i32
  }
  func.func @transform_1(%arg0: i32) -> (i32, i32) {
    %c0_i32 = arith.constant 0 : i32
    %c0_i32_0 = arith.constant 0 : i32
    %c0_i32_1 = arith.constant 0 : i32
    return %c0_i32, %c0_i32_0 : i32, i32
  }
  func.func @transform_2(%arg0: i32) -> (i32, i32) {
    %c0_i32 = arith.constant 0 : i32
    %c0_i32_0 = arith.constant 0 : i32
    %c0_i32_1 = arith.constant 0 : i32
    return %c0_i32, %c0_i32_0 : i32, i32
  }
  func.func @transform_3(%arg0: i32) -> (i32, i32) {
    %c0_i32 = arith.constant 0 : i32
    %c0_i32_0 = arith.constant 0 : i32
    return %arg0, %c0_i32 : i32, i32
  }
}

</mosaic_0001>

<bundles_post_ra>
// kernel: _vision_tower_forward.1
= control target key start
LH: loop header
LB: loop body
LE: loop exit
PB: predicated region body
PF: predicated region fallthrough
CT: control target
= control target key end

     0   :  { %s366_s1 = inlined_call_operand.vmem [shape: bf16[256,128], index: 1, kind: input, shape index: {}]   ;;  %s367_s0 = inlined_call_operand.vmem [shape: bf16[16,256], index: 0, kind: input, shape index: {}]   ;;  %s368_s2 = inlined_call_operand.vmem [shape: f32[1,128], index: 2, kind: input, shape index: {}]   ;;  %s369_s3 = inlined_call_operand.vmem [shape: bf16[16,128], index: 3, kind: output, shape index: {}]  }
   0x1   :  { %v267_v0 = vld [vmem:[%s366_s1 + $0x40] sm:$0xff]   ;;  %v269_v2 = vld [vmem:[%s366_s1 + $0x48] sm:$0xff]   ;;  %v271_v4 = vld [vmem:[%s366_s1 + $0x50] sm:$0xff]  }
   0x2   :  { %v268_v1 = vld [vmem:[%s366_s1] sm:$0xff]   ;;  %245 = vmatprep.subr.bf16.mxu0 %v267_v0  ;;  %v270_v3 = vld [vmem:[%s366_s1 + $0x8] sm:$0xff]   ;;  %v272_v5 = vld [vmem:[%s366_s1 + $0x10] sm:$0xff]  }
   0x3   :  { %246 = vmatpush3.bf16.msra.mxu0 %v268_v1  ;;  %v273_v6 = vld [vmem:[%s366_s1 + $0x58] sm:$0xff]   ;;  %v275_v8 = vld [vmem:[%s366_s1 + $0x60] sm:$0xff]   ;;  %v277_v10 = vld [vmem:[%s366_s1 + $0x68] sm:$0xff]  }
   0x4   :  { %247 = vmatprep.subr.bf16.mxu0 %v269_v2  ;;  %v274_v7 = vld [vmem:[%s366_s1 + $0x18] sm:$0xff]   ;;  %v276_v9 = vld [vmem:[%s366_s1 + $0x20] sm:$0xff]   ;;  %v278_v12 = vld [vmem:[%s366_s1 + $0x28] sm:$0xff]  }
   0x5   :  { %v285_v11 = vld [vmem:[%s367_s0 + $0x4] ss:$8 sps:$4 sm:$0xff]   ;;  %v279_v13 = vld [vmem:[%s366_s1 + $0x70] sm:$0xff]   ;;  %v281_v15 = vld [vmem:[%s366_s1 + $0x78] sm:$0xff]  }
   0x6   :  { %194 = vmatprep.mubr.bf16.mxu0 %v285_v11  ;;  %v280_v14 = vld [vmem:[%s366_s1 + $0x30] sm:$0xff]   ;;  %v282_v16 = vld [vmem:[%s366_s1 + $0x38] sm:$0xff]   ;;  %v283_v17 = vld [vmem:[%s367_s0] ss:$8 sps:$4 sm:$0xff]  }
   0x7   :  { %248 = vmatpush3.bf16.msra.mxu0 %v270_v3  ;;  %v217_v22 = vld [vmem:[%s368_s2] ss:$0 sm:$0xff] }
   0x8   :  { %249 = vmatprep.subr.bf16.mxu0 %v271_v4 }
   0xb   :  { %250 = vmatpush3.bf16.msra.mxu0 %v272_v5 }
   0xc   :  { %251 = vmatprep.subr.bf16.mxu0 %v273_v6 }
   0xf   :  { %252 = vmatpush3.bf16.msra.mxu0 %v274_v7 }
  0x10   :  { %253 = vmatprep.subr.bf16.mxu0 %v275_v8 }
  0x13   :  { %254 = vmatpush3.bf16.msra.mxu0 %v276_v9 }
  0x14   :  { %255 = vmatprep.subr.bf16.mxu0 %v277_v10 }
  0x17   :  { %256 = vmatpush3.bf16.msra.mxu0 %v278_v12 }
  0x18   :  { %257 = vmatprep.subr.bf16.mxu0 %v279_v13 }
  0x1b   :  { %258 = vmatpush3.bf16.msra.mxu0 %v280_v14 }
  0x1c   :  { %259 = vmatprep.subr.bf16.mxu0 %v281_v15 }
  0x1f   :  { %260 = vmatpush3.bf16.msra.mxu0 %v282_v16 }
  0x22   :  { %195 = vmatmul.mubr.bf16.vlgmr.msra.gmra.mrb[0].mxu0 %v283_v17 }
  0xf5   :  { %v261_v18 = vpop.f32.mrb[0].mxu0 }
  0xf6   :  { %v262_v19 = vpop.f32.mrb[1].mxu0 }
  0xf7   :  { %v263_v20 = vadd.f32 %v262_v19, %v261_v18  ;;  %v264_v21 = vpop.f32.mrb[2].mxu0 }
  0xf8   :  { %v265_v23 = vpop.f32.mrb[3].mxu0 }
  0xf9   :  { %v266_v24 = vadd.f32 %v265_v23, %v264_v21  ;;  %v197_v25 = vadd.f32 %v263_v20, %v217_v22 }
  0xfb   :  { %v200_v26 = vadd.f32 %v266_v24, %v217_v22 }
  0xfd   :  { %v243_v27 = vpack.c.bf16 %v200_v26, %v197_v25 }
  0xff   :  { %244 = vst [vmem:[%s369_s3] sm:$0xff] %v243_v27  }

</bundles_post_ra>
